<compile_context>
chip_gen: v6e
topology: v6e:2x2x1
jax: 0.10.0
libtpu: 0.0.40
codegen_flags: <defaults>
</compile_context>

<pallas_src>
import math
import functools

import jax
import jax.numpy as jnp
from jax.experimental import pallas as pl
from jax.experimental.pallas import tpu as pltpu


def _transformer_block_kernel(x_ref, mask_ref,
                              wqkv_ref, bqkv_ref,
                              wproj_ref, bproj_ref,
                              w1_ref, b1_ref,
                              w2_ref, b2_ref,
                              g1_ref, be1_ref,
                              g2_ref, be2_ref,
                              o_ref,
                              *, num_heads, head_size, seq_len, block_b,
                              use_bf16_matmul):
    H, hs, T, Bb = num_heads, head_size, seq_len, block_b
    E = H * hs
    M = Bb * T                              # rows handled by this grid step

    x = x_ref[...].astype(jnp.float32)      # (M, E), rows = flattened (b, t)

    def cast(a):
        return a.astype(jnp.bfloat16) if use_bf16_matmul else a

    def mm(a, b):                           # MXU matmul, f32 accumulation
        return jnp.dot(cast(a), cast(b), preferred_element_type=jnp.float32)

    def bmm(eq, a, b):                      # batched MXU contraction, f32 acc
        return jnp.einsum(eq, cast(a), cast(b),
                          preferred_element_type=jnp.float32)

    def layernorm(v, g, b, eps=1e-5):       # f32 elementwise (v5e-safe)
        mu = jnp.mean(v, axis=-1, keepdims=True)
        var = jnp.mean((v - mu) ** 2, axis=-1, keepdims=True)
        return (v - mu) * jax.lax.rsqrt(var + eps) * g + b

    # ---------------- attention (pre-norm) ----------------
    xn = layernorm(x, g1_ref[...], be1_ref[...])
    qkv = mm(xn, wqkv_ref[...]) + bqkv_ref[...]              # (M, 3E)

    scale = 1.0 / math.sqrt(head_size)
    q = qkv[:, :E] * scale                                   # fold 1/sqrt(hs) once
    k = qkv[:, E:2 * E]
    v = qkv[:, 2 * E:]

    # Re-batch to (Bb*H, T, hs) with static sublane x lane sub-block slices.
    # Attention is now per-sequence (single batch dim -> proven-safe Mosaic
    # batched dot_general), so no work is spent on cross-sequence blocks.
    def to_heads(t):
        return jnp.stack(
            [t[b * T:(b + 1) * T, h * hs:(h + 1) * hs]
             for b in range(Bb) for h in range(H)], axis=0)

    qh, kh, vh = to_heads(q), to_heads(k), to_heads(v)       # (Bb*H, T, hs)

    scores = bmm('nqd,nkd->nqk', qh, kh)                     # (Bb*H, T, T) f32
    scores = scores + mask_ref[...]                          # static (T,T) causal mask (f32, built in wrapper)
    att = jax.nn.softmax(scores, axis=-1)                    # f32 softmax (EUP exp)
    # TODO(synk): attention dropout (p=0.1) omitted -- eval-mode semantics.
    heads_out = bmm('nqk,nkd->nqd', att, vh)                 # (Bb*H, T, hs)

    # Re-assemble heads to (M, E) and do ONE (M,E)x(E,E) projection matmul
    # (K = E, accumulation stays in the MXU result path).
    attn_cat = jnp.concatenate(
        [jnp.concatenate([heads_out[b * H + h] for h in range(H)], axis=1)
         for b in range(Bb)], axis=0)                        # (M, E)
    attn_out = mm(attn_cat, wproj_ref[...]) + bproj_ref[...]
    # TODO(synk): residual-path dropout (p=0.1) omitted -- eval-mode semantics.
    x = x + attn_out

    # ---------------- MLP (pre-norm) ----------------
    xn2 = layernorm(x, g2_ref[...], be2_ref[...])
    h1 = mm(xn2, w1_ref[...]) + b1_ref[...]
    c = math.sqrt(2.0 / math.pi)
    h1 = 0.5 * h1 * (1.0 + jnp.tanh(c * (h1 + 0.044715 * (h1 ** 3))))   # NewGELU, f32
    x = x + mm(h1, w2_ref[...]) + b2_ref[...]

    o_ref[...] = x.astype(o_ref.dtype)
    # TODO(synk): when deployed E < 128 and store-bound, repack the output slab
    # lane-dense (last dim a multiple of 128) to avoid masked vst.msk stores.
    # TODO(synk): for long sequences (T >> 128), switch the attention stage to a
    # flash-style KV-tiled grid axis with online softmax (bounds VMEM to O(T*hs)).
    # TODO(synk): at real model sizes (E=768, F=3072) on v7x (64 MiB VMEM),
    # single-buffer the constant-index weight BlockSpecs or tile fc1/fc2/wqkv
    # over an extra "arbitrary" K/N grid axis instead of keeping them resident.


def _pick_block_b(B, T, target_rows=256):
    """Sequences flattened per grid step.

    Targets M = block_b*T around `target_rows` (feeds the MXU, amortizes the
    ~0.35us/step overhead), keeps the sublane dim a multiple of 8 (or the full
    batch), and prefers >= 2 grid steps when B >= 2 so the "parallel" axis can
    shard across v7x's two TensorCores.
    """
    divisors = [d for d in range(1, B + 1) if B % d == 0]
    valid = [d for d in divisors if d == B or (d * T) % 8 == 0]
    multi = [d for d in valid if B // d >= 2]
    pool = multi if multi else valid
    under = [d for d in pool if d * T <= target_rows]
    return max(under) if under else min(pool)


def _vmem_limit_bytes():
    # 75% of the chip's physical VMEM, capped at 100 MiB (v5e/v6e: 96 MiB,
    # v7x: 48 MiB).  Falls back to a v7x-safe 48 MiB if the query fails.
    try:
        cap = pltpu.get_tpu_info().vmem_capacity_bytes
    except Exception:
        cap = 64 * 1024 * 1024
    return int(min(100 * 1024 * 1024, cap * 3 // 4))


def transformer_block(x, params, num_heads, *, use_bf16_matmul=True):
    B, T, E = x.shape
    F = params["w1"].shape[1]
    assert E % num_heads == 0
    hs = E // num_heads

    block_b = _pick_block_b(B, T)
    n_blocks = B // block_b
    M = block_b * T

    # Flatten (B, T, E) -> (B*T, E); the dense matmuls see M = block_b*T rows.
    x2 = x.reshape(B * T, E)

    # Weights shipped as bf16 by default (MXU-native on all generations);
    # halves resident-weight VMEM.  Elementwise math stays f32 in-kernel.
    wdt = jnp.bfloat16 if use_bf16_matmul else params["wqkv"].dtype
    wqkv = params["wqkv"].astype(wdt)
    wproj = params["wproj"].astype(wdt)
    w1 = params["w1"].astype(wdt)
    w2 = params["w2"].astype(wdt)

    # Static causal additive mask, built ONCE here (finite -1e30, kept f32).
    mask_add = jnp.where(jnp.tril(jnp.ones((T, T), dtype=bool)),
                         jnp.float32(0.0), jnp.float32(-1e30))

    def rows_spec():
        return pl.BlockSpec((M, E), lambda i: (i, 0))

    def full(shape):
        return pl.BlockSpec(shape, lambda i: (0,) * len(shape))

    kernel = functools.partial(
        _transformer_block_kernel,
        num_heads=num_heads, head_size=hs, seq_len=T, block_b=block_b,
        use_bf16_matmul=use_bf16_matmul)

    out2 = pl.pallas_call(
        kernel,
        out_shape=jax.ShapeDtypeStruct((B * T, E), x.dtype),
        grid=(n_blocks,),
        in_specs=[
            rows_spec(),                                  # x rows (flattened B*T)
            full((T, T)),                                 # causal additive mask
            full((E, 3 * E)), full((1, 3 * E)),           # c_attn
            full((E, E)), full((1, E)),                   # c_proj
            full((E, F)), full((1, F)),                   # mlp fc1
            full((F, E)), full((1, E)),                   # mlp fc2
            full((1, E)), full((1, E)),                   # ln1 gamma/beta
            full((1, E)), full((1, E)),                   # ln2 gamma/beta
        ],
        out_specs=rows_spec(),
        compiler_params=pltpu.CompilerParams(
            dimension_semantics=("parallel",),
            vmem_limit_bytes=_vmem_limit_bytes()),
    )(x2,
      mask_add,
      wqkv, params["bqkv"],
      wproj, params["bproj"],
      w1, params["b1"],
      w2, params["b2"],
      params["g1"], params["be1"],
      params["g2"], params["be2"])

    return out2.reshape(B, T, E)


def transformer_block_reference(x, params, num_heads):
    """Pure-JAX mirror of the PyTorch module (eval mode), for correctness check."""
    B, T, E = x.shape
    hs = E // num_heads

    def ln(v, g, b, eps=1e-5):
        mu = v.mean(-1, keepdims=True)
        var = ((v - mu) ** 2).mean(-1, keepdims=True)
        return (v - mu) / jnp.sqrt(var + eps) * g + b

    xn = ln(x, params["g1"][0], params["be1"][0])
    qkv = xn @ params["wqkv"] + params["bqkv"][0]
    q, k, v = jnp.split(qkv, 3, axis=-1)

    def heads(t):
        return t.reshape(B, T, num_heads, hs).transpose(0, 2, 1, 3)

    Q, K, V = heads(q), heads(k), heads(v)
    att = jnp.einsum('bhqd,bhkd->bhqk', Q, K) / math.sqrt(hs)
    mask = jnp.tril(jnp.ones((T, T), bool))
    att = jnp.where(mask, att, -jnp.inf)
    att = jax.nn.softmax(att, axis=-1)
    out = jnp.einsum('bhqk,bhkd->bhqd', att, V).transpose(0, 2, 1, 3).reshape(B, T, E)
    out = out @ params["wproj"] + params["bproj"][0]
    x = x + out

    xn2 = ln(x, params["g2"][0], params["be2"][0])
    h1 = xn2 @ params["w1"] + params["b1"][0]
    c = math.sqrt(2.0 / math.pi)
    h1 = 0.5 * h1 * (1.0 + jnp.tanh(c * (h1 + 0.044715 * h1 ** 3)))
    return x + h1 @ params["w2"] + params["b2"][0]


def init_params(key, embed_dim, ff_dim):
    ks = jax.random.split(key, 6)
    E, Fd = embed_dim, ff_dim
    s = 0.02
    return {
        "wqkv":  jax.random.normal(ks[0], (E, 3 * E), jnp.float32) * s,
        "bqkv":  jnp.zeros((1, 3 * E), jnp.float32),
        "wproj": jax.random.normal(ks[1], (E, E), jnp.float32) * s,
        "bproj": jnp.zeros((1, E), jnp.float32),
        "w1":    jax.random.normal(ks[2], (E, Fd), jnp.float32) * s,
        "b1":    jnp.zeros((1, Fd), jnp.float32),
        "w2":    jax.random.normal(ks[3], (Fd, E), jnp.float32) * s,
        "b2":    jnp.zeros((1, E), jnp.float32),
        "g1":    jnp.ones((1, E), jnp.float32),
        "be1":   jnp.zeros((1, E), jnp.float32),
        "g2":    jnp.ones((1, E), jnp.float32),
        "be2":   jnp.zeros((1, E), jnp.float32),
    }


if __name__ == "__main__":
    # Shapes implied by the module: B=2, T=max_length=8, embed_dim=32,
    # ff_dim=64, num_heads=4 (head_size=8)
    B, T, E, FF, H = 2, 8, 32, 64, 4

    key = jax.random.PRNGKey(0)
    kx, kp = jax.random.split(key)
    x = jax.random.normal(kx, (B, T, E), jnp.float32)
    params = init_params(kp, E, FF)

    ref = transformer_block_reference(x, params, H)

    # Default path: bf16 MXU operands (MXU-native on v5e/v6e/v7x), f32 accumulation
    # and f32 elementwise math.
    out_bf16 = jax.block_until_ready(transformer_block(x, params, H))
    assert out_bf16.shape == (B, T, E)
    assert bool(jnp.all(jnp.isfinite(out_bf16)))
    assert float(jnp.max(jnp.abs(out_bf16 - ref))) < 1e-1

    # f32-operand path (default MXU precision; tighter tolerance).
    out_f32 = jax.block_until_ready(
        transformer_block(x, params, H, use_bf16_matmul=False))
    assert out_f32.shape == (B, T, E)
    assert bool(jnp.all(jnp.isfinite(out_f32)))
    assert float(jnp.max(jnp.abs(out_f32 - ref))) < 5e-2

    print("KERNEL_OK")
</pallas_src>

<mosaic_0001>
module attributes {stable_mosaic.version = 11 : i64} {
  func.func @_transformer_block_kernel(%arg0: i32, %arg1: memref<8x32xf32, #tpu.memory_space<vmem>>, %arg2: memref<8x8xf32, #tpu.memory_space<vmem>>, %arg3: memref<32x96xbf16, #tpu.memory_space<vmem>>, %arg4: memref<1x96xf32, #tpu.memory_space<vmem>>, %arg5: memref<32x32xbf16, #tpu.memory_space<vmem>>, %arg6: memref<1x32xf32, #tpu.memory_space<vmem>>, %arg7: memref<32x64xbf16, #tpu.memory_space<vmem>>, %arg8: memref<1x64xf32, #tpu.memory_space<vmem>>, %arg9: memref<64x32xbf16, #tpu.memory_space<vmem>>, %arg10: memref<1x32xf32, #tpu.memory_space<vmem>>, %arg11: memref<1x32xf32, #tpu.memory_space<vmem>>, %arg12: memref<1x32xf32, #tpu.memory_space<vmem>>, %arg13: memref<1x32xf32, #tpu.memory_space<vmem>>, %arg14: memref<1x32xf32, #tpu.memory_space<vmem>>, %arg15: memref<8x32xf32, #tpu.memory_space<vmem>>) attributes {dimension_semantics = [#tpu.dimension_semantics<parallel>], iteration_bounds = array<i64: 2>, scalar_prefetch = 0 : i64, scratch_operands = 0 : i64, tpu.core_type = #tpu.core_type<tc>, window_params = [{transform_indices = @transform_0, window_bounds = array<i64: 8, 32>}, {pipeline_mode = #tpu.pipeline_mode<synchronous>, transform_indices = @transform_1, window_bounds = array<i64: 8, 8>}, {pipeline_mode = #tpu.pipeline_mode<synchronous>, transform_indices = @transform_2, window_bounds = array<i64: 32, 96>}, {pipeline_mode = #tpu.pipeline_mode<synchronous>, transform_indices = @transform_3, window_bounds = array<i64: 1, 96>}, {pipeline_mode = #tpu.pipeline_mode<synchronous>, transform_indices = @transform_4, window_bounds = array<i64: 32, 32>}, {pipeline_mode = #tpu.pipeline_mode<synchronous>, transform_indices = @transform_5, window_bounds = array<i64: 1, 32>}, {pipeline_mode = #tpu.pipeline_mode<synchronous>, transform_indices = @transform_6, window_bounds = array<i64: 32, 64>}, {pipeline_mode = #tpu.pipeline_mode<synchronous>, transform_indices = @transform_7, window_bounds = array<i64: 1, 64>}, {pipeline_mode = #tpu.pipeline_mode<synchronous>, transform_indices = @transform_8, window_bounds = array<i64: 64, 32>}, {pipeline_mode = #tpu.pipeline_mode<synchronous>, transform_indices = @transform_9, window_bounds = array<i64: 1, 32>}, {pipeline_mode = #tpu.pipeline_mode<synchronous>, transform_indices = @transform_10, window_bounds = array<i64: 1, 32>}, {pipeline_mode = #tpu.pipeline_mode<synchronous>, transform_indices = @transform_11, window_bounds = array<i64: 1, 32>}, {pipeline_mode = #tpu.pipeline_mode<synchronous>, transform_indices = @transform_12, window_bounds = array<i64: 1, 32>}, {pipeline_mode = #tpu.pipeline_mode<synchronous>, transform_indices = @transform_13, window_bounds = array<i64: 1, 32>}, {transform_indices = @transform_14, window_bounds = array<i64: 8, 32>}]} {
    %c0 = arith.constant 0 : index
    %c0_0 = arith.constant 0 : index
    %0 = vector.load %arg1[%c0, %c0_0] : memref<8x32xf32, #tpu.memory_space<vmem>>, vector<8x32xf32>
    %c0_1 = arith.constant 0 : index
    %c0_2 = arith.constant 0 : index
    %1 = vector.load %arg11[%c0_1, %c0_2] : memref<1x32xf32, #tpu.memory_space<vmem>>, vector<1x32xf32>
    %c0_3 = arith.constant 0 : index
    %c0_4 = arith.constant 0 : index
    %2 = vector.load %arg12[%c0_3, %c0_4] : memref<1x32xf32, #tpu.memory_space<vmem>>, vector<1x32xf32>
    %cst = arith.constant dense<0.000000e+00> : vector<8xf32>
    %3 = vector.multi_reduction <add>, %0, %cst [1] : vector<8x32xf32> to vector<8xf32>
    %4 = vector.shape_cast %3 : vector<8xf32> to vector<8x1xf32>
    %cst_5 = arith.constant 3.200000e+01 : f32
    %5 = vector.broadcast %cst_5 : f32 to vector<8x1xf32>
    %6 = arith.divf %4, %5 : vector<8x1xf32>
    %7 = vector.broadcast %6 : vector<8x1xf32> to vector<8x32xf32>
    %8 = arith.subf %0, %7 : vector<8x32xf32>
    %9 = arith.mulf %8, %8 : vector<8x32xf32>
    %cst_6 = arith.constant dense<0.000000e+00> : vector<8xf32>
    %10 = vector.multi_reduction <add>, %9, %cst_6 [1] : vector<8x32xf32> to vector<8xf32>
    %11 = vector.shape_cast %10 : vector<8xf32> to vector<8x1xf32>
    %cst_7 = arith.constant 3.200000e+01 : f32
    %12 = vector.broadcast %cst_7 : f32 to vector<8x1xf32>
    %13 = arith.divf %11, %12 : vector<8x1xf32>
    %14 = vector.broadcast %6 : vector<8x1xf32> to vector<8x32xf32>
    %15 = arith.subf %0, %14 : vector<8x32xf32>
    %cst_8 = arith.constant 9.99999974E-6 : f32
    %16 = vector.broadcast %cst_8 : f32 to vector<8x1xf32>
    %17 = arith.addf %13, %16 : vector<8x1xf32>
    %18 = math.rsqrt %17 : vector<8x1xf32>
    %19 = vector.broadcast %18 : vector<8x1xf32> to vector<8x32xf32>
    %20 = arith.mulf %15, %19 : vector<8x32xf32>
    %21 = vector.broadcast %1 : vector<1x32xf32> to vector<8x32xf32>
    %22 = arith.mulf %20, %21 : vector<8x32xf32>
    %23 = vector.broadcast %2 : vector<1x32xf32> to vector<8x32xf32>
    %24 = arith.addf %22, %23 : vector<8x32xf32>
    %c0_9 = arith.constant 0 : index
    %c0_10 = arith.constant 0 : index
    %25 = vector.load %arg3[%c0_9, %c0_10] : memref<32x96xbf16, #tpu.memory_space<vmem>>, vector<32x96xbf16>
    %26 = arith.truncf %24 : vector<8x32xf32> to vector<8x32xbf16>
    %cst_11 = arith.constant dense<0.000000e+00> : vector<8x96xf32>
    %27 = tpu.matmul %26, %25, %cst_11 {dimension_numbers = #tpu.dot_dimension_numbers<[1], [0], [0], [1], [0, 0, 1, 1], [], []>} : vector<8x32xbf16>, vector<32x96xbf16>, vector<8x96xf32> -> vector<8x96xf32>
    %c0_12 = arith.constant 0 : index
    %c0_13 = arith.constant 0 : index
    %28 = vector.load %arg4[%c0_12, %c0_13] : memref<1x96xf32, #tpu.memory_space<vmem>>, vector<1x96xf32>
    %29 = vector.broadcast %28 : vector<1x96xf32> to vector<8x96xf32>
    %30 = arith.addf %27, %29 : vector<8x96xf32>
    %31 = vector.extract_strided_slice %30 {offsets = [0, 0], sizes = [8, 32], strides = [1, 1]} : vector<8x96xf32> to vector<8x32xf32>
    %cst_14 = arith.constant 0.353553385 : f32
    %32 = vector.broadcast %cst_14 : f32 to vector<8x32xf32>
    %33 = arith.mulf %31, %32 : vector<8x32xf32>
    %34 = vector.extract_strided_slice %30 {offsets = [0, 32], sizes = [8, 32], strides = [1, 1]} : vector<8x96xf32> to vector<8x32xf32>
    %35 = vector.extract_strided_slice %30 {offsets = [0, 64], sizes = [8, 32], strides = [1, 1]} : vector<8x96xf32> to vector<8x32xf32>
    %36 = vector.extract_strided_slice %33 {offsets = [0, 0], sizes = [8, 8], strides = [1, 1]} : vector<8x32xf32> to vector<8x8xf32>
    %37 = vector.extract_strided_slice %33 {offsets = [0, 8], sizes = [8, 8], strides = [1, 1]} : vector<8x32xf32> to vector<8x8xf32>
    %38 = vector.extract_strided_slice %33 {offsets = [0, 16], sizes = [8, 8], strides = [1, 1]} : vector<8x32xf32> to vector<8x8xf32>
    %39 = vector.extract_strided_slice %33 {offsets = [0, 24], sizes = [8, 8], strides = [1, 1]} : vector<8x32xf32> to vector<8x8xf32>
    %40 = vector.shape_cast %36 : vector<8x8xf32> to vector<1x8x8xf32>
    %41 = vector.shape_cast %37 : vector<8x8xf32> to vector<1x8x8xf32>
    %42 = vector.shape_cast %38 : vector<8x8xf32> to vector<1x8x8xf32>
    %43 = vector.shape_cast %39 : vector<8x8xf32> to vector<1x8x8xf32>
    %44 = tpu.concatenate %40, %41, %42, %43 in 0 : vector<1x8x8xf32>, vector<1x8x8xf32>, vector<1x8x8xf32>, vector<1x8x8xf32> -> vector<4x8x8xf32>
    %45 = vector.extract_strided_slice %34 {offsets = [0, 0], sizes = [8, 8], strides = [1, 1]} : vector<8x32xf32> to vector<8x8xf32>
    %46 = vector.extract_strided_slice %34 {offsets = [0, 8], sizes = [8, 8], strides = [1, 1]} : vector<8x32xf32> to vector<8x8xf32>
    %47 = vector.extract_strided_slice %34 {offsets = [0, 16], sizes = [8, 8], strides = [1, 1]} : vector<8x32xf32> to vector<8x8xf32>
    %48 = vector.extract_strided_slice %34 {offsets = [0, 24], sizes = [8, 8], strides = [1, 1]} : vector<8x32xf32> to vector<8x8xf32>
    %49 = vector.shape_cast %45 : vector<8x8xf32> to vector<1x8x8xf32>
    %50 = vector.shape_cast %46 : vector<8x8xf32> to vector<1x8x8xf32>
    %51 = vector.shape_cast %47 : vector<8x8xf32> to vector<1x8x8xf32>
    %52 = vector.shape_cast %48 : vector<8x8xf32> to vector<1x8x8xf32>
    %53 = tpu.concatenate %49, %50, %51, %52 in 0 : vector<1x8x8xf32>, vector<1x8x8xf32>, vector<1x8x8xf32>, vector<1x8x8xf32> -> vector<4x8x8xf32>
    %54 = vector.extract_strided_slice %35 {offsets = [0, 0], sizes = [8, 8], strides = [1, 1]} : vector<8x32xf32> to vector<8x8xf32>
    %55 = vector.extract_strided_slice %35 {offsets = [0, 8], sizes = [8, 8], strides = [1, 1]} : vector<8x32xf32> to vector<8x8xf32>
    %56 = vector.extract_strided_slice %35 {offsets = [0, 16], sizes = [8, 8], strides = [1, 1]} : vector<8x32xf32> to vector<8x8xf32>
    %57 = vector.extract_strided_slice %35 {offsets = [0, 24], sizes = [8, 8], strides = [1, 1]} : vector<8x32xf32> to vector<8x8xf32>
    %58 = vector.shape_cast %54 : vector<8x8xf32> to vector<1x8x8xf32>
    %59 = vector.shape_cast %55 : vector<8x8xf32> to vector<1x8x8xf32>
    %60 = vector.shape_cast %56 : vector<8x8xf32> to vector<1x8x8xf32>
    %61 = vector.shape_cast %57 : vector<8x8xf32> to vector<1x8x8xf32>
    %62 = tpu.concatenate %58, %59, %60, %61 in 0 : vector<1x8x8xf32>, vector<1x8x8xf32>, vector<1x8x8xf32>, vector<1x8x8xf32> -> vector<4x8x8xf32>
    %63 = arith.truncf %44 : vector<4x8x8xf32> to vector<4x8x8xbf16>
    %64 = arith.truncf %53 : vector<4x8x8xf32> to vector<4x8x8xbf16>
    "tpu.trace_start"() <{level = 10 : i32, message = "nqd,nkd->nqk"}> : () -> ()
    %cst_15 = arith.constant dense<0.000000e+00> : vector<4x8x8xf32>
    %65 = tpu.matmul %63, %64, %cst_15 {dimension_numbers = #tpu.dot_dimension_numbers<[2], [2], [1], [1], [0, 0, 0, 1, 1, 1], [0], [0]>} : vector<4x8x8xbf16>, vector<4x8x8xbf16>, vector<4x8x8xf32> -> vector<4x8x8xf32>
    "tpu.trace_stop"() : () -> ()
    %c0_16 = arith.constant 0 : index
    %c0_17 = arith.constant 0 : index
    %66 = vector.load %arg2[%c0_16, %c0_17] : memref<8x8xf32, #tpu.memory_space<vmem>>, vector<8x8xf32>
    %67 = vector.shape_cast %66 : vector<8x8xf32> to vector<1x8x8xf32>
    %68 = vector.broadcast %67 : vector<1x8x8xf32> to vector<4x8x8xf32>
    %69 = arith.addf %65, %68 : vector<4x8x8xf32>
    %cst_18 = arith.constant dense<0xFF800000> : vector<4x8xf32>
    %70 = vector.multi_reduction <maximumf>, %69, %cst_18 [2] : vector<4x8x8xf32> to vector<4x8xf32>
    %cst_19 = arith.constant 0xFF800000 : f32
    %71 = vector.broadcast %cst_19 : f32 to vector<4x8xf32>
    %72 = arith.maximumf %71, %70 : vector<4x8xf32>
    %73 = vector.shape_cast %72 : vector<4x8xf32> to vector<4x8x1xf32>
    %74 = vector.broadcast %73 : vector<4x8x1xf32> to vector<4x8x8xf32>
    %75 = arith.subf %69, %74 : vector<4x8x8xf32>
    %76 = math.exp %75 : vector<4x8x8xf32>
    %cst_20 = arith.constant dense<0.000000e+00> : vector<4x8xf32>
    %77 = vector.multi_reduction <add>, %76, %cst_20 [2] : vector<4x8x8xf32> to vector<4x8xf32>
    %78 = vector.shape_cast %77 : vector<4x8xf32> to vector<4x8x1xf32>
    %79 = vector.broadcast %78 : vector<4x8x1xf32> to vector<4x8x8xf32>
    %80 = arith.divf %76, %79 : vector<4x8x8xf32>
    %81 = arith.truncf %80 : vector<4x8x8xf32> to vector<4x8x8xbf16>
    %82 = arith.truncf %62 : vector<4x8x8xf32> to vector<4x8x8xbf16>
    "tpu.trace_start"() <{level = 10 : i32, message = "nqk,nkd->nqd"}> : () -> ()
    %cst_21 = arith.constant dense<0.000000e+00> : vector<4x8x8xf32>
    %83 = tpu.matmul %81, %82, %cst_21 {dimension_numbers = #tpu.dot_dimension_numbers<[2], [1], [1], [2], [0, 0, 0, 1, 1, 2], [0], [0]>} : vector<4x8x8xbf16>, vector<4x8x8xbf16>, vector<4x8x8xf32> -> vector<4x8x8xf32>
    "tpu.trace_stop"() : () -> ()
    %84 = vector.extract_strided_slice %83 {offsets = [0, 0, 0], sizes = [1, 8, 8], strides = [1, 1, 1]} : vector<4x8x8xf32> to vector<1x8x8xf32>
    %85 = vector.shape_cast %84 : vector<1x8x8xf32> to vector<8x8xf32>
    %86 = vector.extract_strided_slice %83 {offsets = [1, 0, 0], sizes = [1, 8, 8], strides = [1, 1, 1]} : vector<4x8x8xf32> to vector<1x8x8xf32>
    %87 = vector.shape_cast %86 : vector<1x8x8xf32> to vector<8x8xf32>
    %88 = vector.extract_strided_slice %83 {offsets = [2, 0, 0], sizes = [1, 8, 8], strides = [1, 1, 1]} : vector<4x8x8xf32> to vector<1x8x8xf32>
    %89 = vector.shape_cast %88 : vector<1x8x8xf32> to vector<8x8xf32>
    %90 = vector.extract_strided_slice %83 {offsets = [3, 0, 0], sizes = [1, 8, 8], strides = [1, 1, 1]} : vector<4x8x8xf32> to vector<1x8x8xf32>
    %91 = vector.shape_cast %90 : vector<1x8x8xf32> to vector<8x8xf32>
    %92 = tpu.concatenate %85, %87, %89, %91 in 1 : vector<8x8xf32>, vector<8x8xf32>, vector<8x8xf32>, vector<8x8xf32> -> vector<8x32xf32>
    %c0_22 = arith.constant 0 : index
    %c0_23 = arith.constant 0 : index
    %93 = vector.load %arg5[%c0_22, %c0_23] : memref<32x32xbf16, #tpu.memory_space<vmem>>, vector<32x32xbf16>
    %94 = arith.truncf %92 : vector<8x32xf32> to vector<8x32xbf16>
    %cst_24 = arith.constant dense<0.000000e+00> : vector<8x32xf32>
    %95 = tpu.matmul %94, %93, %cst_24 {dimension_numbers = #tpu.dot_dimension_numbers<[1], [0], [0], [1], [0, 0, 1, 1], [], []>} : vector<8x32xbf16>, vector<32x32xbf16>, vector<8x32xf32> -> vector<8x32xf32>
    %c0_25 = arith.constant 0 : index
    %c0_26 = arith.constant 0 : index
    %96 = vector.load %arg6[%c0_25, %c0_26] : memref<1x32xf32, #tpu.memory_space<vmem>>, vector<1x32xf32>
    %97 = vector.broadcast %96 : vector<1x32xf32> to vector<8x32xf32>
    %98 = arith.addf %95, %97 : vector<8x32xf32>
    %99 = arith.addf %0, %98 : vector<8x32xf32>
    %c0_27 = arith.constant 0 : index
    %c0_28 = arith.constant 0 : index
    %100 = vector.load %arg13[%c0_27, %c0_28] : memref<1x32xf32, #tpu.memory_space<vmem>>, vector<1x32xf32>
    %c0_29 = arith.constant 0 : index
    %c0_30 = arith.constant 0 : index
    %101 = vector.load %arg14[%c0_29, %c0_30] : memref<1x32xf32, #tpu.memory_space<vmem>>, vector<1x32xf32>
    %cst_31 = arith.constant dense<0.000000e+00> : vector<8xf32>
    %102 = vector.multi_reduction <add>, %99, %cst_31 [1] : vector<8x32xf32> to vector<8xf32>
    %103 = vector.shape_cast %102 : vector<8xf32> to vector<8x1xf32>
    %cst_32 = arith.constant 3.200000e+01 : f32
    %104 = vector.broadcast %cst_32 : f32 to vector<8x1xf32>
    %105 = arith.divf %103, %104 : vector<8x1xf32>
    %106 = vector.broadcast %105 : vector<8x1xf32> to vector<8x32xf32>
    %107 = arith.subf %99, %106 : vector<8x32xf32>
    %108 = arith.mulf %107, %107 : vector<8x32xf32>
    %cst_33 = arith.constant dense<0.000000e+00> : vector<8xf32>
    %109 = vector.multi_reduction <add>, %108, %cst_33 [1] : vector<8x32xf32> to vector<8xf32>
    %110 = vector.shape_cast %109 : vector<8xf32> to vector<8x1xf32>
    %cst_34 = arith.constant 3.200000e+01 : f32
    %111 = vector.broadcast %cst_34 : f32 to vector<8x1xf32>
    %112 = arith.divf %110, %111 : vector<8x1xf32>
    %113 = vector.broadcast %105 : vector<8x1xf32> to vector<8x32xf32>
    %114 = arith.subf %99, %113 : vector<8x32xf32>
    %cst_35 = arith.constant 9.99999974E-6 : f32
    %115 = vector.broadcast %cst_35 : f32 to vector<8x1xf32>
    %116 = arith.addf %112, %115 : vector<8x1xf32>
    %117 = math.rsqrt %116 : vector<8x1xf32>
    %118 = vector.broadcast %117 : vector<8x1xf32> to vector<8x32xf32>
    %119 = arith.mulf %114, %118 : vector<8x32xf32>
    %120 = vector.broadcast %100 : vector<1x32xf32> to vector<8x32xf32>
    %121 = arith.mulf %119, %120 : vector<8x32xf32>
    %122 = vector.broadcast %101 : vector<1x32xf32> to vector<8x32xf32>
    %123 = arith.addf %121, %122 : vector<8x32xf32>
    %c0_36 = arith.constant 0 : index
    %c0_37 = arith.constant 0 : index
    %124 = vector.load %arg7[%c0_36, %c0_37] : memref<32x64xbf16, #tpu.memory_space<vmem>>, vector<32x64xbf16>
    %125 = arith.truncf %123 : vector<8x32xf32> to vector<8x32xbf16>
    %cst_38 = arith.constant dense<0.000000e+00> : vector<8x64xf32>
    %126 = tpu.matmul %125, %124, %cst_38 {dimension_numbers = #tpu.dot_dimension_numbers<[1], [0], [0], [1], [0, 0, 1, 1], [], []>} : vector<8x32xbf16>, vector<32x64xbf16>, vector<8x64xf32> -> vector<8x64xf32>
    %c0_39 = arith.constant 0 : index
    %c0_40 = arith.constant 0 : index
    %127 = vector.load %arg8[%c0_39, %c0_40] : memref<1x64xf32, #tpu.memory_space<vmem>>, vector<1x64xf32>
    %128 = vector.broadcast %127 : vector<1x64xf32> to vector<8x64xf32>
    %129 = arith.addf %126, %128 : vector<8x64xf32>
    %cst_41 = arith.constant 5.000000e-01 : f32
    %130 = vector.broadcast %cst_41 : f32 to vector<8x64xf32>
    %131 = arith.mulf %130, %129 : vector<8x64xf32>
    %132 = arith.mulf %129, %129 : vector<8x64xf32>
    %133 = arith.mulf %129, %132 : vector<8x64xf32>
    %cst_42 = arith.constant 4.471500e-02 : f32
    %134 = vector.broadcast %cst_42 : f32 to vector<8x64xf32>
    %135 = arith.mulf %134, %133 : vector<8x64xf32>
    %136 = arith.addf %129, %135 : vector<8x64xf32>
    %cst_43 = arith.constant 0.797884583 : f32
    %137 = vector.broadcast %cst_43 : f32 to vector<8x64xf32>
    %138 = arith.mulf %137, %136 : vector<8x64xf32>
    %139 = math.tanh %138 : vector<8x64xf32>
    %cst_44 = arith.constant 1.000000e+00 : f32
    %140 = vector.broadcast %cst_44 : f32 to vector<8x64xf32>
    %141 = arith.addf %140, %139 : vector<8x64xf32>
    %142 = arith.mulf %131, %141 : vector<8x64xf32>
    %c0_45 = arith.constant 0 : index
    %c0_46 = arith.constant 0 : index
    %143 = vector.load %arg9[%c0_45, %c0_46] : memref<64x32xbf16, #tpu.memory_space<vmem>>, vector<64x32xbf16>
    %144 = arith.truncf %142 : vector<8x64xf32> to vector<8x64xbf16>
    %cst_47 = arith.constant dense<0.000000e+00> : vector<8x32xf32>
    %145 = tpu.matmul %144, %143, %cst_47 {dimension_numbers = #tpu.dot_dimension_numbers<[1], [0], [0], [1], [0, 0, 1, 1], [], []>} : vector<8x64xbf16>, vector<64x32xbf16>, vector<8x32xf32> -> vector<8x32xf32>
    %146 = arith.addf %99, %145 : vector<8x32xf32>
    %c0_48 = arith.constant 0 : index
    %c0_49 = arith.constant 0 : index
    %147 = vector.load %arg10[%c0_48, %c0_49] : memref<1x32xf32, #tpu.memory_space<vmem>>, vector<1x32xf32>
    %148 = vector.broadcast %147 : vector<1x32xf32> to vector<8x32xf32>
    %149 = arith.addf %146, %148 : vector<8x32xf32>
    %c0_50 = arith.constant 0 : index
    %c0_51 = arith.constant 0 : index
    %150 = vector.load %arg15[%c0_50, %c0_51] : memref<8x32xf32, #tpu.memory_space<vmem>>, vector<8x32xf32>
    tpu.vector_store %arg15[%c0_50, %c0_51], %149 {strides = array<i32>} : memref<8x32xf32, #tpu.memory_space<vmem>>, vector<8x32xf32>,
    return
  }
  func.func @transform_0(%arg0: i32) -> (i32, i32) {
    %c0_i32 = arith.constant 0 : i32
    %c0_i32_0 = arith.constant 0 : i32
    return %arg0, %c0_i32 : i32, i32
  }
  func.func @transform_1(%arg0: i32) -> (i32, i32) {
    %c0_i32 = arith.constant 0 : i32
    %c0_i32_0 = arith.constant 0 : i32
    %c0_i32_1 = arith.constant 0 : i32
    return %c0_i32, %c0_i32_0 : i32, i32
  }
  func.func @transform_2(%arg0: i32) -> (i32, i32) {
    %c0_i32 = arith.constant 0 : i32
    %c0_i32_0 = arith.constant 0 : i32
    %c0_i32_1 = arith.constant 0 : i32
    return %c0_i32, %c0_i32_0 : i32, i32
  }
  func.func @transform_3(%arg0: i32) -> (i32, i32) {
    %c0_i32 = arith.constant 0 : i32
    %c0_i32_0 = arith.constant 0 : i32
    %c0_i32_1 = arith.constant 0 : i32
    return %c0_i32, %c0_i32_0 : i32, i32
  }
  func.func @transform_4(%arg0: i32) -> (i32, i32) {
    %c0_i32 = arith.constant 0 : i32
    %c0_i32_0 = arith.constant 0 : i32
    %c0_i32_1 = arith.constant 0 : i32
    return %c0_i32, %c0_i32_0 : i32, i32
  }
  func.func @transform_5(%arg0: i32) -> (i32, i32) {
    %c0_i32 = arith.constant 0 : i32
    %c0_i32_0 = arith.constant 0 : i32
    %c0_i32_1 = arith.constant 0 : i32
    return %c0_i32, %c0_i32_0 : i32, i32
  }
  func.func @transform_6(%arg0: i32) -> (i32, i32) {
    %c0_i32 = arith.constant 0 : i32
    %c0_i32_0 = arith.constant 0 : i32
    %c0_i32_1 = arith.constant 0 : i32
    return %c0_i32, %c0_i32_0 : i32, i32
  }
  func.func @transform_7(%arg0: i32) -> (i32, i32) {
    %c0_i32 = arith.constant 0 : i32
    %c0_i32_0 = arith.constant 0 : i32
    %c0_i32_1 = arith.constant 0 : i32
    return %c0_i32, %c0_i32_0 : i32, i32
  }
  func.func @transform_8(%arg0: i32) -> (i32, i32) {
    %c0_i32 = arith.constant 0 : i32
    %c0_i32_0 = arith.constant 0 : i32
    %c0_i32_1 = arith.constant 0 : i32
    return %c0_i32, %c0_i32_0 : i32, i32
  }
  func.func @transform_9(%arg0: i32) -> (i32, i32) {
    %c0_i32 = arith.constant 0 : i32
    %c0_i32_0 = arith.constant 0 : i32
    %c0_i32_1 = arith.constant 0 : i32
    return %c0_i32, %c0_i32_0 : i32, i32
  }
  func.func @transform_10(%arg0: i32) -> (i32, i32) {
    %c0_i32 = arith.constant 0 : i32
    %c0_i32_0 = arith.constant 0 : i32
    %c0_i32_1 = arith.constant 0 : i32
    return %c0_i32, %c0_i32_0 : i32, i32
  }
  func.func @transform_11(%arg0: i32) -> (i32, i32) {
    %c0_i32 = arith.constant 0 : i32
    %c0_i32_0 = arith.constant 0 : i32
    %c0_i32_1 = arith.constant 0 : i32
    return %c0_i32, %c0_i32_0 : i32, i32
  }
  func.func @transform_12(%arg0: i32) -> (i32, i32) {
    %c0_i32 = arith.constant 0 : i32
    %c0_i32_0 = arith.constant 0 : i32
    %c0_i32_1 = arith.constant 0 : i32
    return %c0_i32, %c0_i32_0 : i32, i32
  }
  func.func @transform_13(%arg0: i32) -> (i32, i32) {
    %c0_i32 = arith.constant 0 : i32
    %c0_i32_0 = arith.constant 0 : i32
    %c0_i32_1 = arith.constant 0 : i32
    return %c0_i32, %c0_i32_0 : i32, i32
  }
  func.func @transform_14(%arg0: i32) -> (i32, i32) {
    %c0_i32 = arith.constant 0 : i32
    %c0_i32_0 = arith.constant 0 : i32
    return %arg0, %c0_i32 : i32, i32
  }
}

</mosaic_0001>

<bundles_post_ra>
// kernel: tpu_custom_call.1
= control target key start
LH: loop header
LB: loop body
LE: loop exit
PB: predicated region body
PF: predicated region fallthrough
CT: control target
= control target key end

     0   :  { %19 = vsyncpa [#allocation3], 0  ;;  %s2198_s0 = inlined_call_operand.vmem [shape: f32[16,32], index: 0, kind: input, shape index: {}]   ;;  %s2199_s1 = inlined_call_operand.hbm [shape: f32[8,8], index: 1, kind: input, shape index: {}]   ;;  %s2200_s2 = inlined_call_operand.vmem [shape: bf16[32,96], index: 2, kind: input, shape index: {}]   ;;  %s2201_s3 = inlined_call_operand.vmem [shape: f32[1,96], index: 3, kind: input, shape index: {}]   ;;  %s2202_s4 = inlined_call_operand.vmem [shape: bf16[32,32], index: 4, kind: input, shape index: {}]   ;;  %s2203_s5 = inlined_call_operand.vmem [shape: f32[1,32], index: 5, kind: input, shape index: {}]   ;;  %s2204_s6 = inlined_call_operand.hbm [shape: bf16[32,64], index: 6, kind: input, shape index: {}]   ;;  %s2205_s7 = inlined_call_operand.vmem [shape: f32[1,64], index: 7, kind: input, shape index: {}]   ;;  %s2206_s8 = inlined_call_operand.vmem [shape: bf16[64,32], index: 8, kind: input, shape index: {}]   ;;  %s2207_s9 = inlined_call_operand.vmem [shape: f32[1,32], index: 9, kind: input, shape index: {}]   ;;  %s2208_s10 = inlined_call_operand.vmem [shape: f32[1,32], index: 10, kind: input, shape index: {}]   ;;  %s2209_s11 = inlined_call_operand.vmem [shape: f32[1,32], index: 11, kind: input, shape index: {}]   ;;  %s2210_s12 = inlined_call_operand.vmem [shape: f32[1,32], index: 12, kind: input, shape index: {}]   ;;  %s2211_s13 = inlined_call_operand.vmem [shape: f32[1,32], index: 13, kind: input, shape index: {}]   ;;  %s2212_s14 = inlined_call_operand.hbm [shape: f32[16,32], index: 14, kind: output, shape index: {}]  }
   0x1   :  { %20 = vsyncpa [#allocation6], 0 }
   0x2   :  { %21 = vsyncpa [#allocation4], 0 }
   0x3   :  { %23 = vsyncpa [#allocation4 + $0x1], 0  ;;  %s1905_s29 = smov 0   ;;  %s1907_s30 = smov 0  }
   0x4   :  { %s1909_s15 = smov 0   ;;  %s1911_s16 = smov 0  }
   0x5 LB: > { %2220 = sst [smem:[#allocation11_spill]] %s1809_s15  ;;  %s1926_s17 = sadd.s32 4294967295, %s1813_s16   ;;  %s1813_s16 = sphi %s1911_s16, %s2236_s16   ;;  %s1809_s15 = sphi %s1909_s15, %s2238_s15   ;;  %s1805_s30 = sphi %s1907_s30, %s2240_s30   ;;  %s1801_s29 = sphi %s1905_s29, %s2239_s29  }
   0x6   : > { %s1431_s18 = sadd.s32 4294967294, %s1813_s16   ;;  %s1930_s19 = sadd.s32 1, %s1813_s16  }
   0x7   : > { %2221 = sst [smem:[#allocation12_spill]] %s1930_s19  ;;  %s335_s20 = sadd.s32 1, %s1809_s15 }
   0x8   : > { %s332_s21 = ssub.s32 %s1813_s16, %s1930_s19  ;;  %p345_p0 = scmp.ne.s32.totalorder %s1809_s15, %s1805_s30 }
   0x9   : > { %p333_p1 = scmp.eq.s32.totalorder %s332_s21, 0  ;;  %p346_p2 = scmp.eq.s32.totalorder %s1926_s17, 1 }
   0xa   : > { %p351_p3 = scmp.ne.s32.totalorder %s1805_s30, %s1801_s29  ;;  %p352_p4 = scmp.eq.s32.totalorder %s1431_s18, 1 }
   0xb   : > { %s1941_s22 = scalar_select %p333_p1, %s1809_s15, %s335_s20  }
   0xc   : > { %p1943_p5 = por %p346_p2, %p345_p0  ;;  %p1947_p6 = por %p352_p4, %p351_p3 }
   0xd   : > { %2222 = sst [smem:[#allocation13_spill]] %s1941_s22  ;;  %p1432_p7 = scmp.ge.s32.totalorder %s1813_s16, 1 }
   0xe   : > { %s2223_s23 = scalar_select %p1943_p5, 1, 0 }
   0xf   : > { %s2224_s24 = scalar_select %p1947_p6, 1, 0 }
  0x10   : > { %p359_p8 = scmp.lt.s32.totalorder %s1813_s16, 3  ;;  %p2213_p9 = scmp.eq.s32.totalorder %s1926_s17, 0 }
  0x11   : > { %2225 = sst [smem:[#allocation14_spill]] %s2224_s24  ;;  %s1815_s26 = smov [#allocation2]  }
  0x12   : > { %p1954_p10 = pnand %p1432_p7, %p359_p8  ;;  %s372_s27 = sshll.u32 %s1815_s26, 4  ;;  %s373_s27 = int_to_ptr.vmem [resolvable:$true] %s372_s27 }
  0x13   : > { %s1816_s28 = smov [#allocation5]   ;;  %s1704_s21 = scalar_lea.vmem %s373_s27, 128 }
  0x14   : > { %s2226_s25 = scalar_select %p1954_p10, 1, 0 }
  0x15   : > { %p1599_p11 = pneg %p1954_p10  ;;  %s394_s18 = sshll.u32 %s1816_s28, 4  ;;  %s395_s18 = int_to_ptr.vmem [resolvable:$true] %s394_s18 }
  0x16   : > { %p1705_p0 = scmp.ne.s32.totalorder %s373_s27, %s1704_s21  ;;  %p1712_p3 = scmp.lt.s32.totalorder %s373_s27, %s373_s27 }
  0x17   : > { %p1962_p12 = pnand %p2213_p9, %p1599_p11  ;;  %p1713_p4 = scmp.lt.s32.totalorder %s1704_s21, %s1704_s21 }
  0x19   : > { %p1695_p13 = pneg %p1962_p12  ;;  %p1714_p7 = por %p1713_p4, %p1712_p3 }
  0x1b   : > { %p1707_p1 = pnand %p1705_p0, %p1695_p13 }
  0x1d   : > { %p1708_p2 = pneg %p1707_p1 }
  0x1f   : > { %p1715_p8 = pnand %p1714_p7, %p1708_p2 }
  0x21   : > { %1718 = shalt.err (!%p1715_p8)
}
  0x22   : > { %1602 = dma.hbm_to_vmem [thread:$0]  (!%p1962_p12), %s2199_s1, 128, %s373_s27, [#allocation3]  }
  0x23   : > { %s1730_s22 = scalar_lea.vmem %s395_s18, 256  ;;  %p1738_p0 = scmp.lt.s32.totalorder %s395_s18, %s395_s18 }
  0x24   : > { %p1731_p11 = scmp.ne.s32.totalorder %s395_s18, %s1730_s22  ;;  %p1739_p1 = scmp.lt.s32.totalorder %s1730_s22, %s1730_s22 }
  0x26   : > { %p1733_p9 = pnand %p1731_p11, %p1695_p13  ;;  %p1740_p5 = por %p1739_p1, %p1738_p0 }
  0x28   : > { %p1734_p6 = pneg %p1733_p9 }
  0x2a   : > { %p1741_p10 = pnand %p1740_p5, %p1734_p6 }
  0x2c   : > { %1744 = shalt.err (!%p1741_p10)
}
  0x2d   : > { %s1817_s21 = smov 64   ;;  %s1818_s15 = smov 4  }
  0x2e   : > { %1605 = dma.hbm_to_vmem [thread:$0]  (!%p1962_p12), %s2204_s6, 256, %s395_s18, [#allocation6], %s1817_s21, %s1817_s21, %s1818_s15  }
  0x2f   : > { %p2228_p2 = scmp.ne.s32.totalorder %s2226_s25, 0 }
  0x30   : > { %p2229_p3 = scmp.eq.s32.totalorder (!%p2228_p2), %s1926_s17, 0 }
  0x31   : > { %438 = sbr.rel (%p2228_p2) target bundleno = 2581 (0xa15), region = 76 }
  0x36   : > { %1788 = dma.done.wait (%p2229_p3), [#allocation3], 128   ;;  %p2230_p9 = pmov %p2229_p3 }
  0x37   : > { %p2231_p5 = pmov %p2229_p3 }
  0x38   : > { %1790 = vsyncadd (%p2230_p9), [#allocation3], 4294967168 }
  0x39   : > { %1792 = dma.done.wait (%p2231_p5), [#allocation6], 256   ;;  %p2232_p6 = pmov %p2229_p3 }
  0x3a   : > { %p487_p10 = scmp.lt.s32.totalorder %s1926_s17, 1  ;;  %vm495_vm0 = vcmask 261120   ;;  %v1661_v7 = vld [vmem:[%s2200_s2 + $0x8] sm:$0xff]   ;;  %v1819_v8 = vmov 0.0   ;;  %vm1820_vm1 = vmmov 0   ;;  %v1662_v9 = vld [vmem:[%s2200_s2] sm:$0xff]  }
  0x3b   : > { %1794 = vsyncadd (%p2232_p6), [#allocation6], 4294967040  ;;  %1505 = vmatprep.subr.bf16.mxu0 %v1819_v8  ;;  %1509 = vmatprep.mubr.msk.bf16.mxu0 %vm1820_vm1, %v1819_v8  ;;  %v1441_v14 = vld [vmem:[%s2208_s10] ss:$0 sm:$0xff]  ;;  %s1822_s27 = smov 120   ;;  %s1823_s18 = smov 112  }
  0x3c   : > { %s488_s19 = scalar_select %p487_p10, %s1926_s17, 1  ;;  %1506 = vmatpush3.bf16.msra.mxu0 %v1661_v7  ;;  %1513 = vmatprep.subr.bf16.mxu1 %v1819_v8  ;;  %v1442_v16 = vld [vmem:[%s2209_s11] ss:$0 sm:$0xff]  ;;  %vm624_vm2 = vcmask 64512   ;;  %vm871_vm3 = vcmask 1043456   ;;  %vm1072_vm4 = vcmask 130048  }
  0x3d   : > { %1507 = vmatprep.subr.bf16.mxu0 %v1819_v8  ;;  %1515 = vmatprep.mubr.msk.bf16.mxu1 %vm1820_vm1, %v1819_v8  ;;  %v1443_v20 = vld [vmem:[%s2201_s3] ss:$0 sm:$0xff]  ;;  %s1824_s20 = smov 96   ;;  %s1825_s26 = smov 64   ;;  %vm1074_vm5 = vcmask 195584   ;;  %vm1282_vm6 = vcmask 523264  }
  0x3e   : > { %s1440_s15 = sshll.u32 %s488_s19, 3  ;;  %v620_v49 = vld [vmem:[#allocation2] sm:$0xff]  ;;  %s1826_s22 = smov 8  }
  0x3f   : > { %s490_s25 = scalar_lea.vmem %s2198_s0, %s1440_s15  ;;  %s1827_s24 = smov 16  }
  0x40   : > { %v1999_v0 = vld [vmem:[%s490_s25] sm:$0xff]  ;;  %1508 = vmatpush3.bf16.msra.mxu0 %v1662_v9  ;;  %s1821_s25 = smov 104   ;;  %s484_s21 = sand.u32 1, %s1805_s30  }
  0x41   : > { %v496_v1 = vsel %vm495_vm0, %v1999_v0, 0.0  ;;  %1519 = vmatprep.subr.bf16.mxu0 %v1819_v8  ;;  %s1439_s19 = sshll.u32 %s484_s21, 3  ;;  %p2233_p13 = scmp.ne.s32.totalorder %s2223_s23, 0 }
  0x42   : > { %497 = vadd.xlane.f32.xlu0 %v496_v1 }
  0xcb   : > { %v498_v2 = vpop.xlane.xlu0 %497 }
  0xcc   : > { %v500_v3 = vmul.f32 0.03125, %v498_v2 }
  0xce   : > { %v501_v4 = vsub.f32 %v1999_v0, %v500_v3 }
  0xd0   : > { %v502_v5 = vmul.f32 %v501_v4, %v501_v4 }
  0xd2   : > { %v503_v6 = vsel %vm495_vm0, %v502_v5, 0.0 }
  0xd3   : > { %504 = vadd.xlane.f32.xlu0 %v503_v6 }
 0x15c   : > { %v505_v10 = vpop.xlane.xlu0 %504 }
 0x15d   : > { %v506_v11 = vmul.f32 0.03125, %v505_v10 }
 0x15f   : > { %v507_v12 = vadd.f32 1e-05, %v506_v11 }
 0x161   : > { %1671 = vrsqrt.f32 %v507_v12 }
 0x16e   : > { %v1672_v13 = vpop.eup %1671 }
 0x16f   : > { %v509_v15 = vmul.f32 %v1672_v13, %v501_v4 }
 0x171   : > { %v516_v17 = vmul.f32 %v1441_v14, %v509_v15 }
 0x173   : > { %v523_v18 = vadd.f32 %v1442_v16, %v516_v17 }
 0x175   : > { %v528_v19 = vpack.c.bf16 %v523_v18, %v523_v18 }
 0x177   : > { %1510 = vmatmul.mubr.msk.bf16.vlgmr.msra.gmra.mxu0 %vm495_vm0, %v528_v19 }
 0x178   : > { %1521 = vmatprep.mubr.msk.bf16.mxu0 %vm1820_vm1, %v1819_v8 }
 0x237   : > { %v585_v21 = vpop.f32.mrf.mxu0 }
 0x238   : > { %v586_v22 = vadd.f32 %v1443_v20, %v585_v21 }
 0x239   : > { %v1511_v23 = vpop.f32.mrf.mxu0 }
 0x23a   : > { %609 = vrot.lane.b32.xlu0 %v586_v22, %s1821_s25  ;;  %603 = vrot.lane.b32.xlu1 %v586_v22, %s1822_s27  ;;  %v591_v25 = vmul.f32 0.35355338, %v586_v22  ;;  %v2031_v27 = vpack.c.bf16 %v586_v22, %v586_v22 }
 0x23b   : > { %v588_v24 = vpop.f32.mrf.mxu0 }
 0x23c   : > { %v612_v36 = vpack.c.bf16 %v591_v25, %v591_v25 }
 0x23d   : > { %v1512_v26 = vpop.f32.mrf.mxu0 }
 0x23e   : > { %606 = vrot.lane.b32.xlu1 %v586_v22, %s1823_s18  ;;  %599 = vrot.lane.b32.xlu0 %v591_v25, %s1821_s25  ;;  %s1828_s25 = smov 24  }
 0x242   : > { %622 = vrot.lane.b32.xlu1 %v2031_v27, %s1824_s20 }
 0x246   : > { %593 = vrot.lane.b32.xlu1 %v591_v25, %s1822_s27 }
 0x2ac   : > { %v604_v28 = vpop.permute.xlu1 %603  ;;  %v610_v32 = vpop.permute.xlu0 %609 }
 0x2ad   : > { %v2034_v29 = vpack.c.bf16 %v604_v28, %v604_v28  ;;  %v2040_v34 = vpack.c.bf16 %v610_v32, %v610_v32 }
 0x2af   : > { %672 = vrot.lane.b32.xlu1 %v2034_v29, %s1824_s20 }
 0x2b0   : > { %v607_v30 = vpop.permute.xlu1 %606  ;;  %v600_v45 = vpop.permute.xlu0 %599 }
 0x2b1   : > { %v2037_v31 = vpack.c.bf16 %v607_v30, %v607_v30  ;;  %v615_v48 = vpack.c.bf16 %v600_v45, %v600_v45 }
 0x2b3   : > { %721 = vrot.lane.b32.xlu1 %v2037_v31, %s1824_s20 }
 0x2b4   : > { %v623_v33 = vpop.permute.xlu1 %622 }
 0x2b5   : > { %v629_v35 = vsel %vm624_vm2, %v623_v33, 0 }
 0x2b6   : > { %1514 = vmatpush3.bf16.xpose.msra.mxu1 %v629_v35 }
 0x2b7   : > { %770 = vrot.lane.b32.xlu1 %v2040_v34, %s1824_s20  ;;  %1525 = vmatprep.subr.bf16.mxu1 %v1819_v8 }
 0x2b8   : > { %v594_v37 = vpop.permute.xlu1 %593 }
 0x2b9   : > { %v613_v42 = vpack.c.bf16 %v594_v37, %v594_v37 }
 0x2bb   : > { %596 = vrot.lane.b32.xlu1 %v591_v25, %s1823_s18 }
 0x2bd   : > { %1516 = vmatmul.mubr.msk.bf16.vlgmr.msra.gmra.mxu1 %vm624_vm2, %v612_v36 }
 0x2be   : > { %1527 = vmatprep.mubr.msk.bf16.mxu1 %vm1820_vm1, %v1819_v8 }
 0x321   : > { %v673_v38 = vpop.permute.xlu1 %672 }
 0x322   : > { %v678_v39 = vsel %vm624_vm2, %v673_v38, 0 }
 0x323   : > { %1520 = vmatpush3.bf16.xpose.msra.mxu0 %v678_v39 }
 0x324   : > { %1531 = vmatprep.subr.bf16.mxu0 %v1819_v8 }
 0x325   : > { %v722_v40 = vpop.permute.xlu1 %721 }
 0x326   : > { %v727_v41 = vsel %vm624_vm2, %v722_v40, 0 }
 0x327   : > { %1526 = vmatpush3.bf16.xpose.msra.mxu1 %v727_v41 }
 0x328   : > { %1537 = vmatprep.subr.bf16.mxu1 %v1819_v8 }
 0x329   : > { %v771_v43 = vpop.permute.xlu1 %770 }
 0x32a   : > { %v776_v44 = vsel %vm624_vm2, %v771_v43, 0  ;;  %1522 = vmatmul.mubr.msk.bf16.vlgmr.msra.gmra.mxu0 %vm624_vm2, %v613_v42 }
 0x32b   : > { %1532 = vmatpush3.bf16.xpose.msra.mxu0 %v776_v44  ;;  %1533 = vmatprep.mubr.msk.bf16.mxu0 %vm1820_vm1, %v1819_v8 }
 0x32c   : > { %1543 = vmatprep.subr.bf16.mxu0 %v1819_v8 }
 0x32d   : > { %v597_v46 = vpop.permute.xlu1 %596 }
 0x32e   : > { %v614_v47 = vpack.c.bf16 %v597_v46, %v597_v46 }
 0x330   : > { %1528 = vmatmul.mubr.msk.bf16.vlgmr.msra.gmra.mxu1 %vm624_vm2, %v614_v47 }
 0x331   : > { %1539 = vmatprep.mubr.msk.bf16.mxu1 %vm1820_vm1, %v1819_v8 }
 0x332   : > { %1534 = vmatmul.mubr.msk.bf16.vlgmr.msra.gmra.mxu0 %vm624_vm2, %v615_v48 }
 0x333   : > { %1545 = vmatprep.mubr.msk.bf16.mxu0 %vm1820_vm1, %v1819_v8 }
 0x37d   : > { %v665_v50 = vpop.f32.mrf.mxu1 }
 0x37e   : > { %v666_v51 = vadd.f32 %v665_v50, %v620_v49 }
 0x37f   : > { %v1517_v52 = vpop.f32.mrf.mxu1 }
 0x380   : > { %v818_v53 = vsel %vm624_vm2, %v666_v51, -inf }
 0x381   : > { %819 = vmax.xlane.f32.xlu1 %v818_v53  ;;  %v668_v54 = vpop.f32.mrf.mxu1 }
 0x383   : > { %v1518_v55 = vpop.f32.mrf.mxu1 }
 0x3ea   : > { %v714_v56 = vpop.f32.mrf.mxu0 }
 0x3eb   : > { %v715_v57 = vadd.f32 %v714_v56, %v620_v49 }
 0x3ec   : > { %v1523_v58 = vpop.f32.mrf.mxu0 }
 0x3ed   : > { %v821_v59 = vsel %vm624_vm2, %v715_v57, -inf }
 0x3ee   : > { %822 = vmax.xlane.f32.xlu0 %v821_v59  ;;  %v717_v60 = vpop.f32.mrf.mxu0 }
 0x3ef   : > { %v1663_v60 = vld [vmem:[%s2202_s4 + $0x8] sm:$0xff]  }
 0x3f0   : > { %v1524_v61 = vpop.f32.mrf.mxu0  ;;  %v763_v62 = vpop.f32.mrf.mxu1 }
 0x3f1   : > { %v764_v63 = vadd.f32 %v763_v62, %v620_v49  ;;  %v1664_v61 = vld [vmem:[%s2202_s4] sm:$0xff]  }
 0x3f2   : > { %v1529_v1 = vpop.f32.mrf.mxu1  ;;  %v812_v2 = vpop.f32.mrf.mxu0 }
 0x3f3   : > { %v813_v3 = vadd.f32 %v812_v2, %v620_v49  ;;  %v824_v4 = vsel %vm624_vm2, %v764_v63, -inf }
 0x3f4   : > { %v766_v5 = vpop.f32.mrf.mxu1  ;;  %825 = vmax.xlane.f32.xlu0 %v824_v4  ;;  %v1535_v6 = vpop.f32.mrf.mxu0 }
 0x3f5   : > { %v827_v7 = vsel %vm624_vm2, %v813_v3, -inf }
 0x3f6   : > { %v1530_v9 = vpop.f32.mrf.mxu1  ;;  %828 = vmax.xlane.f32.xlu1 %v827_v7  ;;  %v815_v10 = vpop.f32.mrf.mxu0 }
 0x3f8   : > { %v1536_v11 = vpop.f32.mrf.mxu0 }
 0x407   : > { %915 = vrot.lane.b32.xlu1 %v2034_v29, %s1825_s26 }
 0x40a   : > { %866 = vrot.lane.b32.xlu0 %v2031_v27, %s1825_s26  ;;  %v820_v12 = vpop.xlane.xlu1 %819 }
 0x40b   : > { %v830_v13 = vsub.f32 %v666_v51, %v820_v12 }
 0x40d   : > { %v834_v14 = vmul.f32 1.442695, %v830_v13 }
 0x40f   : > { %1673 = vpow2.f32 %v834_v14 }
 0x41c   : > { %v1674_v15 = vpop.eup %1673 }
 0x41d   : > { %v842_v16 = vsel %vm624_vm2, %v1674_v15, 0.0 }
 0x429   : > { %843 = vadd.xlane.f32.xlu0 %v842_v16 }
 0x477   : > { %v823_v17 = vpop.xlane.xlu0 %822 }
 0x478   : > { %v831_v18 = vsub.f32 %v715_v57, %v823_v17 }
 0x47a   : > { %v836_v19 = vmul.f32 1.442695, %v831_v18 }
 0x47c   : > { %1675 = vpow2.f32 %v836_v19  ;;  %v1455_v19 = vld [vmem:[%s2203_s5] ss:$0 sm:$0xff] }
 0x47d   : > { %v826_v20 = vpop.xlane.xlu0 %825 }
 0x47e   : > { %v832_v21 = vsub.f32 %v764_v63, %v826_v20 }
 0x47f   : > { %v829_v22 = vpop.xlane.xlu1 %828 }
 0x480   : > { %v838_v23 = vmul.f32 1.442695, %v832_v21  ;;  %v833_v24 = vsub.f32 %v813_v3, %v829_v22 }
 0x481   : > { %v867_v25 = vpop.permute.xlu0 %866 }
 0x482   : > { %1677 = vpow2.f32 %v838_v23  ;;  %v840_v26 = vmul.f32 1.442695, %v833_v24  ;;  %v873_v27 = vsel %vm871_vm3, %v867_v25, 0 }
 0x483   : > { %1538 = vmatpush3.bf16.msra.mxu1 %v873_v27  ;;  %v916_v28 = vpop.permute.xlu1 %915 }
 0x484   : > { %1679 = vpow2.f32 %v840_v26  ;;  %v921_v29 = vsel %vm871_vm3, %v916_v28, 0  ;;  %1549 = vmatprep.subr.bf16.mxu1 %v1819_v8 }
 0x485   : > { %1544 = vmatpush3.bf16.msra.mxu0 %v921_v29 }
 0x486   : > { %1555 = vmatprep.subr.bf16.mxu0 %v1819_v8 }
 0x489   : > { %v1676_v30 = vpop.eup %1675 }
 0x48a   : > { %v845_v32 = vsel %vm624_vm2, %v1676_v30, 0.0 }
 0x48b   : > { %846 = vadd.xlane.f32.xlu1 %v845_v32 }
 0x48f   : > { %v1678_v33 = vpop.eup %1677 }
 0x490   : > { %v848_v35 = vsel %vm624_vm2, %v1678_v33, 0.0 }
 0x491   : > { %v1680_v36 = vpop.eup %1679  ;;  %849 = vadd.xlane.f32.xlu0 %v848_v35  ;;  %v1666_v35 = vld [vmem:[#allocation5] sm:$0xff]  }
 0x492   : > { %v851_v37 = vsel %vm624_vm2, %v1680_v36, 0.0 }
 0x493   : > { %852 = vadd.xlane.f32.xlu1 %v851_v37 }
 0x4a4   : > { %963 = vrot.lane.b32.xlu1 %v2037_v31, %s1825_s26 }
 0x4a7   : > { %1011 = vrot.lane.b32.xlu0 %v2040_v34, %s1825_s26 }
 0x4b2   : > { %v844_v38 = vpop.xlane.xlu0 %843 }
 0x4b3   : > { %1681 = vrcp.f32 %v844_v38 }
 0x4c0   : > { %v1682_v39 = vpop.eup %1681 }
 0x4c1   : > { %v855_v40 = vmul.f32 %v1682_v39, %v1674_v15  ;;  %v1459_v39 = vld [vmem:[%s2210_s12] ss:$0 sm:$0xff] }
 0x4c3   : > { %v862_v41 = vpack.c.bf16 %v855_v40, %v855_v40 }
 0x4c5   : > { %1540 = vmatmul.mubr.msk.bf16.vlgmr.msra.gmra.mxu1 %vm624_vm2, %v862_v41  ;;  %v1460_v41 = vld [vmem:[%s2211_s13] ss:$0 sm:$0xff] }
 0x4c6   : > { %1551 = vmatprep.mubr.msk.bf16.mxu1 %vm1820_vm1, %v1819_v8 }
 0x514   : > { %v847_v42 = vpop.xlane.xlu1 %846 }
 0x515   : > { %1683 = vrcp.f32 %v847_v42 }
 0x51a   : > { %v850_v43 = vpop.xlane.xlu0 %849 }
 0x51b   : > { %1685 = vrcp.f32 %v850_v43 }
 0x51c   : > { %v853_v44 = vpop.xlane.xlu1 %852 }
 0x51d   : > { %1687 = vrcp.f32 %v853_v44 }
 0x51e   : > { %v1012_v47 = vpop.permute.xlu0 %1011 }
 0x51f   : > { %v1017_v49 = vsel %vm871_vm3, %v1012_v47, 0  ;;  %v1461_v47 = vld [vmem:[%s2205_s7] ss:$0 sm:$0xff] }
 0x520   : > { %v964_v31 = vpop.permute.xlu1 %963 }
 0x521   : > { %v969_v45 = vsel %vm871_vm3, %v964_v31, 0  ;;  %v1667_v31 = vld [vmem:[%s2206_s8 + $0x18] sm:$0xff]  }
 0x522   : > { %v1684_v34 = vpop.eup %1683  ;;  %1550 = vmatpush3.bf16.msra.mxu1 %v969_v45  ;;  %v1668_v45 = vld [vmem:[%s2206_s8 + $0x10] sm:$0xff]  }
 0x523   : > { %v857_v46 = vmul.f32 %v1684_v34, %v1676_v30  ;;  %1561 = vmatprep.subr.bf16.mxu1 %v1819_v8  ;;  %v1669_v34 = vld [vmem:[%s2206_s8 + $0x8] sm:$0xff]  }
 0x525   : > { %v863_v48 = vpack.c.bf16 %v857_v46, %v857_v46  ;;  %v1670_v46 = vld [vmem:[%s2206_s8] sm:$0xff]  }
 0x527   : > { %1546 = vmatmul.mubr.msk.bf16.vlgmr.msra.gmra.mxu0 %vm624_vm2, %v863_v48 }
 0x528   : > { %v1686_v50 = vpop.eup %1685  ;;  %1556 = vmatpush3.bf16.msra.mxu0 %v1017_v49  ;;  %1557 = vmatprep.mubr.msk.bf16.mxu0 %vm1820_vm1, %v1819_v8 }
 0x529   : > { %v859_v51 = vmul.f32 %v1686_v50, %v1678_v33  ;;  %1569 = vmatprep.subr.bf16.mxu0 %v1819_v8  ;;  %v1665_v33 = vld [vmem:[#allocation5 + $0x8] sm:$0xff]  }
 0x52a   : > { %v1688_v52 = vpop.eup %1687 }
 0x52b   : > { %v864_v53 = vpack.c.bf16 %v859_v51, %v859_v51  ;;  %v861_v54 = vmul.f32 %v1688_v52, %v1680_v36 }
 0x52d   : > { %1552 = vmatmul.mubr.msk.bf16.vlgmr.msra.gmra.mxu1 %vm624_vm2, %v864_v53  ;;  %v865_v55 = vpack.c.bf16 %v861_v54, %v861_v54 }
 0x52e   : > { %1565 = vmatprep.mubr.msk.bf16.mxu1 %vm1820_vm1, %v1819_v8  ;;  %1562 = vmatpush3.bf16.msra.mxu1 %v1663_v60 }
 0x52f   : > { %1558 = vmatmul.mubr.msk.bf16.vlgmr.msra.gmra.mxu0 %vm624_vm2, %v865_v55  ;;  %1563 = vmatprep.subr.bf16.mxu1 %v1819_v8 }
 0x530   : > { %1573 = vmatprep.mubr.msk.bf16.mxu0 %vm1820_vm1, %v1819_v8  ;;  %1570 = vmatpush3.bf16.msra.mxu0 %v1665_v33 }
 0x531   : > { %1571 = vmatprep.subr.bf16.mxu0 %v1819_v8 }
 0x532   : > { %1564 = vmatpush3.bf16.msra.mxu1 %v1664_v61 }
 0x533   : > { %1577 = vmatprep.subr.bf16.mxu1 %v1819_v8 }
 0x534   : > { %1572 = vmatpush3.bf16.msra.mxu0 %v1666_v35 }
 0x585   : > { %v909_v56 = vpop.f32.mrf.mxu1 }
 0x587   : > { %v1541_v57 = vpop.f32.mrf.mxu1 }
 0x589   : > { %v912_v58 = vpop.f32.mrf.mxu1 }
 0x58b   : > { %v1542_v59 = vpop.f32.mrf.mxu1 }
 0x5e7   : > { %v957_v62 = vpop.f32.mrf.mxu0 }
 0x5e8   : > { %1060 = vrot.lane.b32.xlu1 %v957_v62, %s1826_s22 }
 0x5e9   : > { %v1547_v63 = vpop.f32.mrf.mxu0 }
 0x5ea   : > { %v1470_v63 = vld [vmem:[%s2207_s9] ss:$0 sm:$0xff] }
 0x5eb   : > { %v960_v1 = vpop.f32.mrf.mxu0 }
 0x5ed   : > { %v1548_v2 = vpop.f32.mrf.mxu0  ;;  %v1005_v3 = vpop.f32.mrf.mxu1 }
 0x5ee   : > { %1064 = vrot.lane.b32.xlu0 %v1005_v3, %s1827_s24  ;;  %s1472_s24 = sshll.u32 %s1926_s17, 7  ;;  %s1337_s17 = scalar_lea.sflag [#allocation4], %s484_s21 }
 0x5ef   : > { %v1553_v4 = vpop.f32.mrf.mxu1  ;;  %v1053_v5 = vpop.f32.mrf.mxu0  ;;  %s2156_s26 = scalar_lea.hbm %s2212_s14, %s1472_s24 }
 0x5f0   : > { %1068 = vrot.lane.b32.xlu1 %v1053_v5, %s1828_s25  ;;  %s486_s25 = scalar_lea.vmem [#allocation7], %s1439_s19  ;;  %s1829_s19 = smov [#allocation7]  }
 0x5f1   : > { %v1008_v6 = vpop.f32.mrf.mxu1  ;;  %v1559_v7 = vpop.f32.mrf.mxu0  ;;  %s1350_s27 = sshll.u32 %s486_s25, 4  ;;  %s1749_s15 = sshll.u32 %s1829_s19, 4  ;;  %s2158_s27 = int_to_ptr.vmem [resolvable:$true] %s1350_s27  ;;  %s1750_s15 = int_to_ptr.vmem [resolvable:$false] %s1749_s15 }
 0x5f2   : > { %s1745_s28 = scalar_lea.vmem %s2158_s27, 128  ;;  %s1751_s22 = scalar_lea.vmem %s1750_s15, 256 }
 0x5f3   : > { %v1554_v9 = vpop.f32.mrf.mxu1  ;;  %v1056_v10 = vpop.f32.mrf.mxu0  ;;  %p1746_p12 = scmp.ne.s32.totalorder %s2158_s27, %s1745_s28  ;;  %p1752_p8 = scmp.lt.s32.totalorder %s2158_s27, %s1750_s15 }
 0x5f4   : > { %p1753_p11 = scmp.lt.s32.totalorder %s1751_s22, %s1745_s28 }
 0x5f5   : > { %v1560_v11 = vpop.f32.mrf.mxu0  ;;  %p1747_p4 = pnand %p1746_p12, %p2233_p13 }
 0x5f6   : > { %p1754_p0 = por %p1753_p11, %p1752_p8 }
 0x5f7   : > { %p1748_p7 = pneg %p1747_p4 }
 0x5f9   : > { %p1755_p1 = pnand %p1754_p0, %p1748_p7 }
 0x65a   : > { %v1061_v12 = vpop.permute.xlu1 %1060 }
 0x65b   : > { %v1071_v13 = vsel %vm624_vm2, %v909_v56, %v1061_v12 }
 0x660   : > { %v1065_v14 = vpop.permute.xlu0 %1064 }
 0x661   : > { %v1073_v15 = vsel %vm1072_vm4, %v1071_v13, %v1065_v14 }
 0x662   : > { %v1069_v16 = vpop.permute.xlu1 %1068 }
 0x663   : > { %v1075_v17 = vsel %vm1074_vm5, %v1073_v15, %v1069_v16 }
 0x664   : > { %v1080_v18 = vpack.c.bf16 %v1075_v17, %v1075_v17 }
 0x666   : > { %1566 = vmatmul.mubr.msk.bf16.vlgmr.msra.gmra.mxu1 %vm495_vm0, %v1080_v18 }
 0x667   : > { %1585 = vmatprep.mubr.msk.bf16.mxu1 %vm1820_vm1, %v1819_v8  ;;  %1578 = vmatpush3.bf16.msra.mxu1 %v1667_v31 }
 0x668   : > { %1579 = vmatprep.subr.bf16.mxu1 %v1819_v8 }
 0x66b   : > { %1580 = vmatpush3.bf16.msra.mxu1 %v1668_v45 }
 0x66c   : > { %1581 = vmatprep.subr.bf16.mxu1 %v1819_v8 }
 0x66f   : > { %1582 = vmatpush3.bf16.msra.mxu1 %v1669_v34 }
 0x670   : > { %1583 = vmatprep.subr.bf16.mxu1 %v1819_v8 }
 0x673   : > { %1584 = vmatpush3.bf16.msra.mxu1 %v1670_v46 }
 0x726   : > { %v1137_v20 = vpop.f32.mrf.mxu1 }
 0x727   : > { %v1138_v21 = vadd.f32 %v1455_v19, %v1137_v20 }
 0x728   : > { %v1567_v22 = vpop.f32.mrf.mxu1 }
 0x729   : > { %v2115_v23 = vadd.f32 %v1138_v21, %v1999_v0 }
 0x72a   : > { %v1140_v24 = vpop.f32.mrf.mxu1 }
 0x72b   : > { %v1146_v25 = vsel %vm495_vm0, %v2115_v23, 0.0 }
 0x72c   : > { %1147 = vadd.xlane.f32.xlu0 %v1146_v25  ;;  %v1568_v26 = vpop.f32.mrf.mxu1 }
 0x7b5   : > { %v1148_v27 = vpop.xlane.xlu0 %1147 }
 0x7b6   : > { %v1149_v28 = vmul.f32 0.03125, %v1148_v27 }
 0x7b8   : > { %v1150_v29 = vsub.f32 %v2115_v23, %v1149_v28 }
 0x7ba   : > { %v1151_v30 = vmul.f32 %v1150_v29, %v1150_v29 }
 0x7bc   : > { %v1152_v32 = vsel %vm495_vm0, %v1151_v30, 0.0 }
 0x7bd   : > { %1153 = vadd.xlane.f32.xlu1 %v1152_v32 }
 0x846   : > { %v1154_v0 = vpop.xlane.xlu1 %1153 }
 0x847   : > { %v1155_v36 = vmul.f32 0.03125, %v1154_v0 }
 0x849   : > { %v1156_v37 = vadd.f32 1e-05, %v1155_v36 }
 0x84b   : > { %1689 = vrsqrt.f32 %v1156_v37 }
 0x858   : > { %v1690_v38 = vpop.eup %1689 }
 0x859   : > { %v1158_v40 = vmul.f32 %v1690_v38, %v1150_v29 }
 0x85b   : > { %v1165_v42 = vmul.f32 %v1459_v39, %v1158_v40 }
 0x85d   : > { %v1172_v43 = vadd.f32 %v1460_v41, %v1165_v42 }
 0x85f   : > { %v1177_v44 = vpack.c.bf16 %v1172_v43, %v1172_v43 }
 0x861   : > { %1574 = vmatmul.mubr.msk.bf16.vlgmr.msra.gmra.mxu0 %vm495_vm0, %v1177_v44 }
 0x921   : > { %v1234_v48 = vpop.f32.mrf.mxu0 }
 0x922   : > { %v1235_v49 = vadd.f32 %v1461_v47, %v1234_v48 }
 0x923   : > { %v1575_v50 = vpop.f32.mrf.mxu0 }
 0x924   : > { %v1241_v51 = vmul.f32 %v1235_v49, %v1235_v49  ;;  %v1240_v58 = vmul.f32 0.5, %v1235_v49 }
 0x925   : > { %v1237_v52 = vpop.f32.mrf.mxu0 }
 0x926   : > { %v1242_v53 = vmul.f32 %v1241_v51, %v1235_v49 }
 0x927   : > { %v1576_v54 = vpop.f32.mrf.mxu0 }
 0x928   : > { %v1243_v55 = vmul.f32 0.044715, %v1242_v53 }
 0x92a   : > { %v1244_v8 = vadd.f32 %v1243_v55, %v1235_v49 }
 0x92c   : > { %v1245_v56 = vmul.f32 0.7978846, %v1244_v8 }
 0x92e   : > { %1691 = vtanh.f32 %v1245_v56 }
 0x93b   : > { %v1692_v57 = vpop.eup %1691 }
 0x93c   : > { %v1247_v59 = vadd.f32 1.0, %v1692_v57 }
 0x93e   : > { %v1248_v60 = vmul.f32 %v1247_v59, %v1240_v58 }
 0x940   : > { %v1257_v61 = vpack.c.bf16 %v1248_v60, %v1248_v60 }
 0x942   : > { %1586 = vmatmul.mubr.msk.bf16.vlgmr.msra.gmra.mxu1 %vm1282_vm6, %v1257_v61 }
 0xa02   : > { %v1320_v62 = vpop.f32.mrf.mxu1 }
 0xa03   : > { %v1326_v1 = vadd.f32 %v1320_v62, %v2115_v23 }
 0xa04   : > { %v1587_v2 = vpop.f32.mrf.mxu1 }
 0xa05   : > { %v1334_v3 = vadd.f32 %v1470_v63, %v1326_v1 }
 0xa06   : > { %v1323_v4 = vpop.f32.mrf.mxu1 }
 0xa07   : > { %1335 = vst.msk [vmem:[%s486_s25] sm:$0xff] %vm495_vm0, %v1334_v3 }
 0xa08   : > { %v1588_v5 = vpop.f32.mrf.mxu1 }
 0xa09   : > { %1758 = shalt.err (!%p1755_p1)
}
 0xa0a   : > { %s1759_s24 = scalar_lea.hbm %s2156_s26, 128  ;;  %s1763_s18 = scalar_lea.hbm %s2212_s14, 256 }
 0xa0b   : > { %p1760_p2 = scmp.ne.s32.totalorder %s2156_s26, %s1759_s24  ;;  %p1764_p5 = scmp.lt.s32.totalorder %s2156_s26, %s2212_s14 }
 0xa0c   : > { %p1765_p6 = scmp.lt.s32.totalorder %s1763_s18, %s1759_s24 }
 0xa0d   : > { %p1761_p3 = pnand %p1760_p2, %p2233_p13 }
 0xa0e   : > { %p1766_p10 = por %p1765_p6, %p1764_p5 }
 0xa0f   : > { %p1762_p9 = pneg %p1761_p3 }
 0xa11   : > { %p1767_p12 = pnand %p1766_p10, %p1762_p9 }
 0xa13   : > { %1770 = shalt.err (!%p1767_p12)
}
 0xa14   : > { %1597 = dma.vmem_to_hbm [thread:$0]  (%p2233_p13), %s2158_s27, 128, %s2156_s26, %s1337_s17  }
 0xa15 PF: > { %s2234_s28 = sld [smem:[#allocation14_spill]]  ;;  %p1614_p4 = scmp.ge.s32.totalorder %s1813_s16, 2 }
 0xa16   : > { %s1362_s15 = sand.u32 1, %s1801_s29  }
 0xa17   : > { %s1363_s22 = scalar_lea.sflag [#allocation4], %s1362_s15 }
 0xa1b   : > { %p2235_p7 = scmp.ne.s32.totalorder %s2234_s28, 0 }
 0xa1d   : > { %p1607_p8 = pnand %p1614_p4, %p2235_p7 }
 0xa1f   : > { %p1608_p11 = pneg %p1607_p8 }
 0xa21   : > { %1796 = dma.done.wait (%p1608_p11), %s1363_s22, 128  }
 0xa22   : > { %1798 = vsyncadd (%p1608_p11), %s1363_s22, 4294967168  ;;  %s2236_s16 = sld [smem:[#allocation12_spill]]  ;;  %s2239_s29 = smov %s1805_s30 }
 0xa23   : > { %s2237_s24 = sld [smem:[#allocation11_spill]] }
 0xa24   : > { %s2238_s15 = sld [smem:[#allocation13_spill]] }
 0xa28   : > { %p26_p0 = scmp.ge.s32.totalorder %s2236_s16, 4  }
 0xa29   : > { %s2240_s30 = smov %s2237_s24 }
 0xa2a   :  { %28 = sbr.rel (!%p26_p0) target bundleno = 5 (0x5), region = 120 }
 0xa2f   :  { %1368 = vsyncpa [#allocation3], 1 }
 0xa30   :  { %1370 = vsyncpa [#allocation3 + $0x1], 1 }
 0xa31   :  { %1371 = vsyncpa [#allocation6], 1 }
 0xa32   :  { %1372 = vsyncpa [#allocation4], 1 }
 0xa33   :  { %1374 = vsyncpa [#allocation4 + $0x1], 1 }

</bundles_post_ra>
